<compile_context>
chip_gen: v5e
topology: v5e:2x2
jax: 0.10.0
libtpu: 0.0.40
codegen_flags: <defaults>
</compile_context>

<pallas_src>
import functools

import jax
import jax.numpy as jnp
from jax.experimental import pallas as pl
from jax.experimental.pallas import tpu as pltpu


def _round_up(x, m):
    return ((x + m - 1) // m) * m


# ----------------------------------------------------------------------------
# Fused kernel: entire ResMLP layer chain, activation kept resident in vregs.
# ----------------------------------------------------------------------------
def _resmlp_fused_kernel(x_ref, w_ref, b_ref, out_ref, *,
                         apply_act, apply_res, use_big_skip):
    h = x_ref[...].astype(jnp.float32)          # (tm, Dpad) — one batch tile
    x0 = h                                      # for optional big skip
    n_layers = len(apply_act)
    for i in range(n_layers):                   # static, fully unrolled
        y = jnp.dot(h, w_ref[i], preferred_element_type=jnp.float32)  # MXU
        y = y + b_ref[i]                        # bias broadcast (1, Dpad)
        if apply_act[i]:
            y = jnp.maximum(y, 0.0)             # ReLU
        if apply_res[i]:
            # scale is pre-folded into w_ref[i] / b_ref[i] at init time
            h = h + y
        else:
            h = y
    if use_big_skip:
        h = h + x0
    out_ref[...] = h.astype(out_ref.dtype)


# ----------------------------------------------------------------------------
# Jitted wrapper: pad → fused pallas_call → slice, all inside one XLA program.
# ----------------------------------------------------------------------------
@functools.partial(
    jax.jit,
    static_argnames=("apply_act", "apply_res", "use_big_skip", "d_out"))
def _resmlp_apply(x, w_stack, b_stack, *, apply_act, apply_res,
                  use_big_skip, d_out):
    batch, d_in = x.shape
    n_layers, d_pad, _ = w_stack.shape

    # Pad batch to the sublane grain (8) and pick a row tile <= 128.
    b_pad = _round_up(max(batch, 8), 8)
    tm = min(128, b_pad)
    b_pad = _round_up(b_pad, tm)
    x_pad = jnp.zeros((b_pad, d_pad), x.dtype).at[:batch, :d_in].set(x)

    kernel = functools.partial(
        _resmlp_fused_kernel,
        apply_act=apply_act, apply_res=apply_res, use_big_skip=use_big_skip,
    )

    flops = 2 * b_pad * d_pad * d_pad * n_layers
    bytes_accessed = (x_pad.size + w_stack.size + b_stack.size
                      + b_pad * d_pad) * 4

    out_pad = pl.pallas_call(
        kernel,
        out_shape=jax.ShapeDtypeStruct((b_pad, d_pad), x.dtype),
        grid_spec=pltpu.PrefetchScalarGridSpec(
            num_scalar_prefetch=0,
            grid=(b_pad // tm,),
            in_specs=[
                pl.BlockSpec((tm, d_pad), lambda i: (i, 0)),                  # x tile
                pl.BlockSpec((n_layers, d_pad, d_pad), lambda i: (0, 0, 0)),  # W stack (resident)
                pl.BlockSpec((n_layers, 1, d_pad), lambda i: (0, 0, 0)),      # b stack (resident)
            ],
            out_specs=pl.BlockSpec((tm, d_pad), lambda i: (i, 0)),
        ),
        compiler_params=pltpu.CompilerParams(
            dimension_semantics=("parallel",),   # batch rows split across TCs (v7x)
        ),
        cost_estimate=pl.CostEstimate(
            flops=flops, transcendentals=0, bytes_accessed=bytes_accessed),
    )(x_pad, w_stack, b_stack)

    # Slice off the zero padding (lane-dense store happened on the padded slab).
    return out_pad[:batch, :d_out]


# ----------------------------------------------------------------------------
# ResMLP module (forward only), parameters built deterministically in-script.
# ----------------------------------------------------------------------------
class ResMLPPallas:
    """Mirror of the PyTorch ResMLP forward (activation=ReLU, use_bn=False)."""

    def __init__(self, layer_sizes, key, use_scale=True, use_big_skip=False):
        self.layer_sizes = tuple(layer_sizes)
        self.n_layers = len(layer_sizes) - 1
        self.scale = (1.0 / self.n_layers) if use_scale else 1.0
        self.use_big_skip = use_big_skip
        if use_big_skip:
            assert layer_sizes[0] == layer_sizes[-1], "big skip needs matching widths"
        # TODO(synk): BatchNorm1d path (use_bn=True) not implemented in-kernel.

        # Per-layer static flags, matching ResMLP.forward:
        #   hidden layers: always ReLU, residual iff square
        #   output layer : ReLU and residual iff square
        acts, ress = [], []
        for i in range(self.n_layers):
            square = layer_sizes[i] == layer_sizes[i + 1]
            is_last = i == self.n_layers - 1
            acts.append(square if is_last else True)
            ress.append(square)
        self.apply_act = tuple(acts)
        self.apply_res = tuple(ress)

        # Raw parameters (torch.nn.Linear default init range), kept unscaled
        # and unpadded for the pure-JAX reference.
        self.weights, self.biases = [], []
        for i in range(self.n_layers):
            d_in, d_out = layer_sizes[i], layer_sizes[i + 1]
            key, kw, kb = jax.random.split(key, 3)
            bound = 1.0 / (d_in ** 0.5)
            w = jax.random.uniform(kw, (d_in, d_out), jnp.float32, -bound, bound)
            b = jax.random.uniform(kb, (d_out,), jnp.float32, -bound, bound)
            self.weights.append(w)
            self.biases.append(b)

        # Padded, lane-dense (multiple of 128), scale-folded stacked parameters
        # for the fused kernel.  Folding is valid because scale > 0 and ReLU is
        # positively homogeneous.
        self.d_pad = _round_up(max(layer_sizes), 128)
        w_stack = jnp.zeros((self.n_layers, self.d_pad, self.d_pad), jnp.float32)
        b_stack = jnp.zeros((self.n_layers, 1, self.d_pad), jnp.float32)
        for i in range(self.n_layers):
            d_in, d_out = layer_sizes[i], layer_sizes[i + 1]
            s = self.scale if self.apply_res[i] else 1.0
            w_stack = w_stack.at[i, :d_in, :d_out].set(s * self.weights[i])
            b_stack = b_stack.at[i, 0, :d_out].set(s * self.biases[i])
        self.w_stack = w_stack
        self.b_stack = b_stack

    def __call__(self, x):
        batch, d_in = x.shape
        assert d_in == self.layer_sizes[0]
        return _resmlp_apply(
            x, self.w_stack, self.b_stack,
            apply_act=self.apply_act, apply_res=self.apply_res,
            use_big_skip=self.use_big_skip, d_out=self.layer_sizes[-1],
        )

    # Pure-JAX reference (unfused, unpadded, explicit scale) for verification.
    def reference(self, x):
        init_x = x
        h = x
        for i in range(self.n_layers - 1):
            identity = h
            y = h @ self.weights[i] + self.biases[i]
            y = jnp.maximum(y, 0.0)
            h = identity + self.scale * y if self.apply_res[i] else y
        identity = h
        y = h @ self.weights[-1] + self.biases[-1]
        if self.apply_res[-1]:
            y = jnp.maximum(y, 0.0)
            h = identity + self.scale * y
        else:
            h = y
        if self.use_big_skip:
            h = init_x + h
        return h


if __name__ == "__main__":
    key = jax.random.PRNGKey(0)
    k_param, k_x = jax.random.split(key)

    # layer_sizes: 16 -> 32 -> 32 -> 32
    #   layer 0: 16->32 (ReLU, no residual), layer 1: 32->32 (ReLU + residual),
    #   output layer: 32->32 (ReLU + residual, per ResMLP.forward).
    layer_sizes = (16, 32, 32, 32)
    batch = 8

    model = ResMLPPallas(layer_sizes, k_param, use_scale=True, use_big_skip=False)
    x = jax.random.normal(k_x, (batch, layer_sizes[0]), jnp.float32)

    out = jax.block_until_ready(model(x))

    ref = model.reference(x)
    assert out.shape == (batch, layer_sizes[-1])
    assert jnp.allclose(out, ref, atol=1e-5, rtol=1e-5), "Pallas output mismatch vs reference"

    print("KERNEL_OK")
</pallas_src>

<mosaic_0001>
module attributes {stable_mosaic.version = 11 : i64} {
  func.func @_resmlp_fused_kernel(%arg0: i32, %arg1: memref<8x128xf32, #tpu.memory_space<vmem>>, %arg2: memref<3x128x128xf32, #tpu.memory_space<vmem>>, %arg3: memref<3x1x128xf32, #tpu.memory_space<vmem>>, %arg4: memref<8x128xf32, #tpu.memory_space<vmem>>) attributes {dimension_semantics = [#tpu.dimension_semantics<parallel>], iteration_bounds = array<i64: 1>, scalar_prefetch = 0 : i64, scratch_operands = 0 : i64, tpu.core_type = #tpu.core_type<tc>, window_params = [{transform_indices = @transform_0, window_bounds = array<i64: 8, 128>}, {pipeline_mode = #tpu.pipeline_mode<synchronous>, transform_indices = @transform_1, window_bounds = array<i64: 3, 128, 128>}, {pipeline_mode = #tpu.pipeline_mode<synchronous>, transform_indices = @transform_2, window_bounds = array<i64: 3, 1, 128>}, {transform_indices = @transform_3, window_bounds = array<i64: 8, 128>}]} {
    %c0 = arith.constant 0 : index
    %c0_0 = arith.constant 0 : index
    %0 = vector.load %arg1[%c0, %c0_0] : memref<8x128xf32, #tpu.memory_space<vmem>>, vector<8x128xf32>
    %c0_1 = arith.constant 0 : index
    %c0_2 = arith.constant 0 : index
    %c0_3 = arith.constant 0 : index
    %1 = vector.load %arg2[%c0_1, %c0_2, %c0_3] : memref<3x128x128xf32, #tpu.memory_space<vmem>>, vector<1x128x128xf32>
    %2 = vector.shape_cast %1 : vector<1x128x128xf32> to vector<128x128xf32>
    %cst = arith.constant dense<0.000000e+00> : vector<8x128xf32>
    %3 = tpu.matmul %0, %2, %cst {dimension_numbers = #tpu.dot_dimension_numbers<[1], [0], [0], [1], [0, 0, 1, 1], [], []>} : vector<8x128xf32>, vector<128x128xf32>, vector<8x128xf32> -> vector<8x128xf32>
    %c0_4 = arith.constant 0 : index
    %c0_5 = arith.constant 0 : index
    %c0_6 = arith.constant 0 : index
    %4 = vector.load %arg3[%c0_4, %c0_5, %c0_6] : memref<3x1x128xf32, #tpu.memory_space<vmem>>, vector<1x1x128xf32>
    %5 = vector.shape_cast %4 : vector<1x1x128xf32> to vector<1x128xf32>
    %6 = vector.broadcast %5 : vector<1x128xf32> to vector<8x128xf32>
    %7 = arith.addf %3, %6 : vector<8x128xf32>
    %cst_7 = arith.constant 0.000000e+00 : f32
    %8 = vector.broadcast %cst_7 : f32 to vector<8x128xf32>
    %9 = arith.maximumf %7, %8 : vector<8x128xf32>
    %c1 = arith.constant 1 : index
    %c0_8 = arith.constant 0 : index
    %c0_9 = arith.constant 0 : index
    %10 = vector.load %arg2[%c1, %c0_8, %c0_9] : memref<3x128x128xf32, #tpu.memory_space<vmem>>, vector<1x128x128xf32>
    %11 = vector.shape_cast %10 : vector<1x128x128xf32> to vector<128x128xf32>
    %cst_10 = arith.constant dense<0.000000e+00> : vector<8x128xf32>
    %12 = tpu.matmul %9, %11, %cst_10 {dimension_numbers = #tpu.dot_dimension_numbers<[1], [0], [0], [1], [0, 0, 1, 1], [], []>} : vector<8x128xf32>, vector<128x128xf32>, vector<8x128xf32> -> vector<8x128xf32>
    %c1_11 = arith.constant 1 : index
    %c0_12 = arith.constant 0 : index
    %c0_13 = arith.constant 0 : index
    %13 = vector.load %arg3[%c1_11, %c0_12, %c0_13] : memref<3x1x128xf32, #tpu.memory_space<vmem>>, vector<1x1x128xf32>
    %14 = vector.shape_cast %13 : vector<1x1x128xf32> to vector<1x128xf32>
    %15 = vector.broadcast %14 : vector<1x128xf32> to vector<8x128xf32>
    %16 = arith.addf %12, %15 : vector<8x128xf32>
    %cst_14 = arith.constant 0.000000e+00 : f32
    %17 = vector.broadcast %cst_14 : f32 to vector<8x128xf32>
    %18 = arith.maximumf %16, %17 : vector<8x128xf32>
    %19 = arith.addf %9, %18 : vector<8x128xf32>
    %c2 = arith.constant 2 : index
    %c0_15 = arith.constant 0 : index
    %c0_16 = arith.constant 0 : index
    %20 = vector.load %arg2[%c2, %c0_15, %c0_16] : memref<3x128x128xf32, #tpu.memory_space<vmem>>, vector<1x128x128xf32>
    %21 = vector.shape_cast %20 : vector<1x128x128xf32> to vector<128x128xf32>
    %cst_17 = arith.constant dense<0.000000e+00> : vector<8x128xf32>
    %22 = tpu.matmul %19, %21, %cst_17 {dimension_numbers = #tpu.dot_dimension_numbers<[1], [0], [0], [1], [0, 0, 1, 1], [], []>} : vector<8x128xf32>, vector<128x128xf32>, vector<8x128xf32> -> vector<8x128xf32>
    %c2_18 = arith.constant 2 : index
    %c0_19 = arith.constant 0 : index
    %c0_20 = arith.constant 0 : index
    %23 = vector.load %arg3[%c2_18, %c0_19, %c0_20] : memref<3x1x128xf32, #tpu.memory_space<vmem>>, vector<1x1x128xf32>
    %24 = vector.shape_cast %23 : vector<1x1x128xf32> to vector<1x128xf32>
    %25 = vector.broadcast %24 : vector<1x128xf32> to vector<8x128xf32>
    %26 = arith.addf %22, %25 : vector<8x128xf32>
    %cst_21 = arith.constant 0.000000e+00 : f32
    %27 = vector.broadcast %cst_21 : f32 to vector<8x128xf32>
    %28 = arith.maximumf %26, %27 : vector<8x128xf32>
    %29 = arith.addf %19, %28 : vector<8x128xf32>
    %c0_22 = arith.constant 0 : index
    %c0_23 = arith.constant 0 : index
    %30 = vector.load %arg4[%c0_22, %c0_23] : memref<8x128xf32, #tpu.memory_space<vmem>>, vector<8x128xf32>
    tpu.vector_store %arg4[%c0_22, %c0_23], %29 {strides = array<i32>} : memref<8x128xf32, #tpu.memory_space<vmem>>, vector<8x128xf32>,
    return
  }
  func.func @transform_0(%arg0: i32) -> (i32, i32) {
    %c0_i32 = arith.constant 0 : i32
    %c0_i32_0 = arith.constant 0 : i32
    return %arg0, %c0_i32 : i32, i32
  }
  func.func @transform_1(%arg0: i32) -> (i32, i32, i32) {
    %c0_i32 = arith.constant 0 : i32
    %c0_i32_0 = arith.constant 0 : i32
    %c0_i32_1 = arith.constant 0 : i32
    %c0_i32_2 = arith.constant 0 : i32
    return %c0_i32, %c0_i32_0, %c0_i32_1 : i32, i32, i32
  }
  func.func @transform_2(%arg0: i32) -> (i32, i32, i32) {
    %c0_i32 = arith.constant 0 : i32
    %c0_i32_0 = arith.constant 0 : i32
    %c0_i32_1 = arith.constant 0 : i32
    %c0_i32_2 = arith.constant 0 : i32
    return %c0_i32, %c0_i32_0, %c0_i32_1 : i32, i32, i32
  }
  func.func @transform_3(%arg0: i32) -> (i32, i32) {
    %c0_i32 = arith.constant 0 : i32
    %c0_i32_0 = arith.constant 0 : i32
    return %arg0, %c0_i32 : i32, i32
  }
}

</mosaic_0001>

<bundles_post_ra>
// kernel: _resmlp_apply.1
= control target key start
LH: loop header
LB: loop body
LE: loop exit
PB: predicated region body
PF: predicated region fallthrough
CT: control target
= control target key end

     0   :  { %8 = vsyncpa [#allocation3], 0  ;;  %s282_s0 = inlined_call_operand.vmem [shape: f32[8,128], index: 0, kind: input, shape index: {}]   ;;  %s283_s1 = inlined_call_operand.hbm [shape: f32[3,128,128], index: 1, kind: input, shape index: {}]   ;;  %s284_s2 = inlined_call_operand.vmem [shape: f32[3,1,128], index: 2, kind: input, shape index: {}]   ;;  %s285_s3 = inlined_call_operand.hbm [shape: f32[8,128], index: 3, kind: output, shape index: {}]  }
   0x1   :  { %9 = vsyncpa [#allocation4], 0  ;;  %s16_s14 = sshll.u32 %s283_s1, 4  ;;  %s240_s15 = smov [#allocation2]   ;;  %s17_s14 = int_to_ptr.hbm [resolvable:$true] %s16_s14 }
   0x2   :  { %s18_s16 = sshll.u32 %s240_s15, 4  ;;  %s241_s17 = smov 128   ;;  %s19_s16 = int_to_ptr.vmem [resolvable:$true] %s18_s16 }
   0x3   :  { %s242_s18 = smov 8  }
   0x4   :  { %24 = dma.hbm_to_vmem [thread:$0]  %s17_s14, 6144, %s19_s16, [#allocation3], %s241_s17, %s241_s17, %s242_s18  }
   0x5   :  { %236 = dma.done.wait [#allocation3], 6144  }
   0x6   :  { %237 = vsyncadd [#allocation3], 4294961152  ;;  %v47_v0 = vld [vmem:[#allocation2 + $0x78] sm:$0xff]  ;;  %v46_v1 = vld [vmem:[#allocation2 + $0x70] sm:$0xff]  ;;  %s243_s25 = smov [#allocation5]   ;;  %s169_s29 = sshll.u32 %s285_s3, 4  ;;  %s170_s29 = int_to_ptr.hbm [resolvable:$true] %s169_s29 }
   0x7   :  { %52 = vmatpush.msra.mxu0 %v47_v0  ;;  %v45_v2 = vld [vmem:[#allocation2 + $0x68] sm:$0xff]  ;;  %v44_v3 = vld [vmem:[#allocation2 + $0x60] sm:$0xff]  ;;  %v89_v4 = vld [vmem:[#allocation2 + $0xf8] sm:$0xff]  ;;  %s167_s26 = sshll.u32 %s243_s25, 4  ;;  %s168_s26 = int_to_ptr.vmem [resolvable:$true] %s167_s26 }
   0x8   :  { %v43_v5 = vld [vmem:[#allocation2 + $0x58] sm:$0xff]  ;;  %95 = vmatpush.msra.mxu1 %v89_v4  ;;  %v88_v6 = vld [vmem:[#allocation2 + $0xf0] sm:$0xff]  ;;  %v87_v7 = vld [vmem:[#allocation2 + $0xe8] sm:$0xff] }
   0x9   :  { %53 = vmatpush.msra.mxu0 %v46_v1  ;;  %v42_v8 = vld [vmem:[#allocation2 + $0x50] sm:$0xff]  ;;  %v86_v9 = vld [vmem:[#allocation2 + $0xe0] sm:$0xff]  ;;  %v41_v10 = vld [vmem:[#allocation2 + $0x48] sm:$0xff] }
   0xa   :  { %96 = vmatpush.msra.mxu1 %v88_v6  ;;  %v85_v11 = vld [vmem:[#allocation2 + $0xd8] sm:$0xff]  ;;  %v40_v12 = vld [vmem:[#allocation2 + $0x40] sm:$0xff]  ;;  %v84_v13 = vld [vmem:[#allocation2 + $0xd0] sm:$0xff] }
   0xb   :  { %54 = vmatpush.msra.mxu0 %v45_v2  ;;  %v39_v14 = vld [vmem:[#allocation2 + $0x38] sm:$0xff]  ;;  %v83_v15 = vld [vmem:[#allocation2 + $0xc8] sm:$0xff]  ;;  %v38_v16 = vld [vmem:[#allocation2 + $0x30] sm:$0xff] }
   0xc   :  { %97 = vmatpush.msra.mxu1 %v87_v7  ;;  %v82_v17 = vld [vmem:[#allocation2 + $0xc0] sm:$0xff]  ;;  %v37_v18 = vld [vmem:[#allocation2 + $0x28] sm:$0xff]  ;;  %v81_v19 = vld [vmem:[#allocation2 + $0xb8] sm:$0xff] }
   0xd   :  { %55 = vmatpush.msra.mxu0 %v44_v3  ;;  %v36_v20 = vld [vmem:[#allocation2 + $0x20] sm:$0xff]  ;;  %v80_v21 = vld [vmem:[#allocation2 + $0xb0] sm:$0xff]  ;;  %v35_v22 = vld [vmem:[#allocation2 + $0x18] sm:$0xff] }
   0xe   :  { %98 = vmatpush.msra.mxu1 %v86_v9  ;;  %v79_v23 = vld [vmem:[#allocation2 + $0xa8] sm:$0xff]  ;;  %v34_v24 = vld [vmem:[#allocation2 + $0x10] sm:$0xff]  ;;  %v78_v25 = vld [vmem:[#allocation2 + $0xa0] sm:$0xff] }
   0xf   :  { %56 = vmatpush.msra.mxu0 %v43_v5  ;;  %v33_v26 = vld [vmem:[#allocation2 + $0x8] sm:$0xff]  ;;  %v77_v27 = vld [vmem:[#allocation2 + $0x98] sm:$0xff]  ;;  %v32_v28 = vld [vmem:[#allocation2] sm:$0xff] }
  0x10   :  { %99 = vmatpush.msra.mxu1 %v85_v11  ;;  %v31_v29 = vld [vmem:[%s282_s0] sm:$0xff]  ;;  %v76_v30 = vld [vmem:[#allocation2 + $0x90] sm:$0xff]  ;;  %v75_v31 = vld [vmem:[#allocation2 + $0x88] sm:$0xff] }
  0x11   :  { %57 = vmatpush.msra.mxu0 %v42_v8  ;;  %v74_v32 = vld [vmem:[#allocation2 + $0x80] sm:$0xff]  ;;  %v133_v33 = vld [vmem:[#allocation2 + $0x178] sm:$0xff]  ;;  %v132_v34 = vld [vmem:[#allocation2 + $0x170] sm:$0xff] }
  0x12   :  { %100 = vmatpush.msra.mxu1 %v84_v13  ;;  %139 = vmatpush.msra.mxu2 %v133_v33  ;;  %v131_v35 = vld [vmem:[#allocation2 + $0x168] sm:$0xff]  ;;  %v130_v36 = vld [vmem:[#allocation2 + $0x160] sm:$0xff]  ;;  %v129_v37 = vld [vmem:[#allocation2 + $0x158] sm:$0xff] }
  0x13   :  { %58 = vmatpush.msra.mxu0 %v41_v10  ;;  %v128_v38 = vld [vmem:[#allocation2 + $0x150] sm:$0xff]  ;;  %v127_v39 = vld [vmem:[#allocation2 + $0x148] sm:$0xff]  ;;  %v126_v40 = vld [vmem:[#allocation2 + $0x140] sm:$0xff] }
  0x14   :  { %101 = vmatpush.msra.mxu1 %v83_v15  ;;  %140 = vmatpush.msra.mxu2 %v132_v34  ;;  %v125_v41 = vld [vmem:[#allocation2 + $0x138] sm:$0xff]  ;;  %v124_v42 = vld [vmem:[#allocation2 + $0x130] sm:$0xff]  ;;  %v123_v43 = vld [vmem:[#allocation2 + $0x128] sm:$0xff] }
  0x15   :  { %59 = vmatpush.msra.mxu0 %v40_v12  ;;  %v122_v44 = vld [vmem:[#allocation2 + $0x120] sm:$0xff]  ;;  %v121_v49 = vld [vmem:[#allocation2 + $0x118] sm:$0xff]  ;;  %v120_v50 = vld [vmem:[#allocation2 + $0x110] sm:$0xff] }
  0x16   :  { %102 = vmatpush.msra.mxu1 %v82_v17  ;;  %141 = vmatpush.msra.mxu2 %v131_v35  ;;  %v185_v45 = vld [vmem:[%s284_s2] ss:$0 sm:$0xff]  ;;  %v119_v51 = vld [vmem:[#allocation2 + $0x108] sm:$0xff]  ;;  %v186_v53 = vld [vmem:[%s284_s2 + $0x1] ss:$0 sm:$0xff] }
  0x17   :  { %60 = vmatpush.msra.mxu0 %v39_v14  ;;  %v118_v52 = vld [vmem:[#allocation2 + $0x100] sm:$0xff] }
  0x18   :  { %103 = vmatpush.msra.mxu1 %v81_v19  ;;  %142 = vmatpush.msra.mxu2 %v130_v36  ;;  %v187_v58 = vld [vmem:[%s284_s2 + $0x2] ss:$0 sm:$0xff] }
  0x19   :  { %61 = vmatpush.msra.mxu0 %v38_v16 }
  0x1a   :  { %104 = vmatpush.msra.mxu1 %v80_v21  ;;  %143 = vmatpush.msra.mxu2 %v129_v37 }
  0x1b   :  { %62 = vmatpush.msra.mxu0 %v37_v18 }
  0x1c   :  { %105 = vmatpush.msra.mxu1 %v79_v23  ;;  %144 = vmatpush.msra.mxu2 %v128_v38 }
  0x1d   :  { %63 = vmatpush.msra.mxu0 %v36_v20 }
  0x1e   :  { %106 = vmatpush.msra.mxu1 %v78_v25  ;;  %145 = vmatpush.msra.mxu2 %v127_v39 }
  0x1f   :  { %64 = vmatpush.msra.mxu0 %v35_v22 }
  0x20   :  { %107 = vmatpush.msra.mxu1 %v77_v27  ;;  %146 = vmatpush.msra.mxu2 %v126_v40 }
  0x21   :  { %65 = vmatpush.msra.mxu0 %v34_v24 }
  0x22   :  { %108 = vmatpush.msra.mxu1 %v76_v30  ;;  %147 = vmatpush.msra.mxu2 %v125_v41 }
  0x23   :  { %66 = vmatpush.msra.mxu0 %v33_v26 }
  0x24   :  { %109 = vmatpush.msra.mxu1 %v75_v31  ;;  %148 = vmatpush.msra.mxu2 %v124_v42 }
  0x25   :  { %67 = vmatpush.msra.mxu0 %v32_v28 }
  0x26   :  { %68 = vmatmul.f32.vlgmr.msra.gmra.mxu0 %v31_v29  ;;  %110 = vmatpush.msra.mxu1 %v74_v32 }
  0x27   :  { %149 = vmatpush.msra.mxu2 %v123_v43 }
  0x29   :  { %150 = vmatpush.msra.mxu2 %v122_v44 }
  0x2b   :  { %151 = vmatpush.msra.mxu2 %v121_v49 }
  0x2d   :  { %152 = vmatpush.msra.mxu2 %v120_v50 }
  0x2f   :  { %153 = vmatpush.msra.mxu2 %v119_v51 }
  0x31   :  { %154 = vmatpush.msra.mxu2 %v118_v52 }
  0xa3   :  { %v69_v46 = vpop.f32.mrf.mxu0 }
  0xa4   :  { %v70_v47 = vadd.f32 %v185_v45, %v69_v46 }
  0xa6   :  { %v72_v48 = vmax.f32 %v70_v47, 0.0 }
  0xa8   :  { %111 = vmatmul.f32.vlgmr.msra.gmra.mxu1 %v72_v48 }
 0x125   :  { %v112_v54 = vpop.f32.mrf.mxu1 }
 0x126   :  { %v113_v55 = vadd.f32 %v186_v53, %v112_v54 }
 0x128   :  { %v115_v56 = vmax.f32 %v113_v55, 0.0 }
 0x12a   :  { %v116_v57 = vadd.f32 %v115_v56, %v72_v48 }
 0x12c   :  { %155 = vmatmul.f32.vlgmr.msra.gmra.mxu2 %v116_v57 }
 0x1af   :  { %v156_v59 = vpop.f32.mrf.mxu2 }
 0x1b0   :  { %v157_v60 = vadd.f32 %v187_v58, %v156_v59 }
 0x1b2   :  { %v159_v61 = vmax.f32 %v157_v60, 0.0 }
 0x1b4   :  { %v160_v62 = vadd.f32 %v159_v61, %v116_v57 }
 0x1b6   :  { %161 = vst [vmem:[#allocation5] sm:$0xff] %v160_v62 }
 0x1b7   :  { %172 = dma.vmem_to_hbm [thread:$0]  %s168_s26, 128, %s170_s29, [#allocation4]  }
 0x1b8   :  { %238 = dma.done.wait [#allocation4], 128  }
 0x1b9   :  { %239 = vsyncadd [#allocation4], 4294967168 }
 0x1ba   :  { %177 = vsyncpa [#allocation3], 1 }
 0x1bb   :  { %178 = vsyncpa [#allocation4], 1 }

</bundles_post_ra>
